<compile_context>
chip_gen: v7x
topology: tpu7x:2x2x1
jax: 0.10.0
libtpu: 0.0.40
codegen_flags: <defaults>
</compile_context>

<pallas_src>
import functools

import jax
import jax.numpy as jnp
from jax.experimental import pallas as pl
from jax.experimental.pallas import tpu as pltpu


def self_output_kernel(x_ref, res_ref, w_ref, b_ref, gamma_ref, beta_ref,
                       out_ref, *, ln_eps, matmul_dtype):
    x = x_ref[...]                       # (TM, D)
    w = w_ref[...]                       # (D, D), stored so y = x @ W + b
    if matmul_dtype is not None:
        # v6e/v7x: bf16 MXU inputs, f32 accumulation.
        x = x.astype(matmul_dtype)
        w = w.astype(matmul_dtype)

    # Dense + bias + ReLU (single MXU push for the whole row tile).
    h = jnp.dot(x, w, preferred_element_type=jnp.float32) + b_ref[...]
    h = jnp.maximum(h, 0.0)

    # Dropout: identity (eval mode).
    y = h + res_ref[...]                 # residual add

    # LayerNorm over the last dim (biased variance, like torch.nn.LayerNorm).
    mean = jnp.mean(y, axis=-1, keepdims=True)
    var = jnp.mean((y - mean) ** 2, axis=-1, keepdims=True)
    y = (y - mean) * jax.lax.rsqrt(var + ln_eps)   # rsqrt -> EUP slot

    out_ref[...] = (y * gamma_ref[...] + beta_ref[...]).astype(out_ref.dtype)


def _choose_block_rows(M, requested=None, target=256):
    """Row-tile size: sublane-aligned (x8), capped at `target`, clamped to M."""
    if requested is not None:
        return requested
    m8 = pl.cdiv(M, 8) * 8
    return min(target, m8)


def self_output_forward(hidden_states, input_tensor, params, *,
                        ln_eps=1e-5, block_rows=None, matmul_dtype=None):
    """LayerNorm(ReLU(hidden_states @ W + b) + input_tensor)."""
    B, S, D = hidden_states.shape
    M = B * S
    x2 = hidden_states.reshape(M, D)
    r2 = input_tensor.reshape(M, D)

    tm = _choose_block_rows(M, block_rows)

    # Pad the row dimension to a multiple of the tile size (sublane-aligned).
    Mp = pl.cdiv(M, tm) * tm
    if Mp != M:
        pad = ((0, Mp - M), (0, 0))
        x2 = jnp.pad(x2, pad)
        r2 = jnp.pad(r2, pad)

    kernel = functools.partial(self_output_kernel,
                               ln_eps=ln_eps,
                               matmul_dtype=matmul_dtype)

    row_spec = pl.BlockSpec((tm, D), lambda i: (i, 0))
    const_spec = lambda shape: pl.BlockSpec(shape, lambda i: (0, 0))

    grid_spec = pltpu.PrefetchScalarGridSpec(
        num_scalar_prefetch=0,
        grid=(Mp // tm,),
        in_specs=[
            row_spec,                    # hidden_states rows
            row_spec,                    # residual (input_tensor) rows
            const_spec((D, D)),          # W   (resident: constant index_map)
            const_spec((1, D)),          # b
            const_spec((1, D)),          # gamma
            const_spec((1, D)),          # beta
        ],
        out_specs=row_spec,
    )

    out = pl.pallas_call(
        kernel,
        grid_spec=grid_spec,
        out_shape=jax.ShapeDtypeStruct((Mp, D), hidden_states.dtype),
        compiler_params=pltpu.CompilerParams(
            # Parallel row-tile axis: serial loop on v5e/v6e (1 TC),
            # split across the 2 TensorCores on v7x.
            dimension_semantics=("parallel",),
            vmem_limit_bytes=64 << 20),
    )(x2, r2, params["w"], params["b"], params["gamma"], params["beta"])

    return out[:M].reshape(B, S, D)


def reference_forward(hidden_states, input_tensor, params, *, ln_eps=1e-5):
    """Pure-JAX reference mirroring the PyTorch SelfOutput forward."""
    h = jnp.maximum(hidden_states @ params["w"] + params["b"][0], 0.0)
    y = h + input_tensor
    mean = y.mean(-1, keepdims=True)
    var = ((y - mean) ** 2).mean(-1, keepdims=True)
    y = (y - mean) / jnp.sqrt(var + ln_eps)
    return y * params["gamma"][0] + params["beta"][0]


def _make_inputs(key, B, S, D):
    k_w, k_b, k_g, k_be, k_x, k_r = jax.random.split(key, 6)
    params = {
        # W stored as (D_in, D_out) so the kernel computes y = x @ W + b
        # (equivalent to nn.Linear's x @ weight.T + bias).
        "w": jax.random.normal(k_w, (D, D), jnp.float32) * 0.05,
        "b": jax.random.normal(k_b, (1, D), jnp.float32) * 0.01,
        "gamma": 1.0 + 0.1 * jax.random.normal(k_g, (1, D), jnp.float32),
        "beta": 0.02 * jax.random.normal(k_be, (1, D), jnp.float32),
    }
    hidden_states = jax.random.normal(k_x, (B, S, D), jnp.float32)
    input_tensor = jax.random.normal(k_r, (B, S, D), jnp.float32)
    return params, hidden_states, input_tensor


if __name__ == "__main__":
    key = jax.random.PRNGKey(0)
    k1, k2 = jax.random.split(key)

    # Small shape matching the module spec: batch=2, seq=8, hidden=32.
    B, S, D = 2, 8, 32
    params, hs, res = _make_inputs(k1, B, S, D)
    out = self_output_forward(hs, res, params)
    jax.block_until_ready(out)
    ref = reference_forward(hs, res, params)
    assert out.shape == (B, S, D)
    assert jnp.allclose(out, ref, atol=1e-4, rtol=1e-4), (
        float(jnp.max(jnp.abs(out - ref))))

    # Larger case: exercises multi-step grid, lane-dense (D % 128 == 0) stores
    # and row padding (M not a multiple of the tile size).
    B2, S2, D2 = 3, 50, 128
    params2, hs2, res2 = _make_inputs(k2, B2, S2, D2)
    out2 = self_output_forward(hs2, res2, params2, block_rows=64)
    jax.block_until_ready(out2)
    ref2 = reference_forward(hs2, res2, params2)
    assert out2.shape == (B2, S2, D2)
    assert jnp.allclose(out2, ref2, atol=1e-4, rtol=1e-4), (
        float(jnp.max(jnp.abs(out2 - ref2))))

    print("KERNEL_OK")
</pallas_src>

<mosaic_0001>
module attributes {stable_mosaic.version = 11 : i64} {
  func.func @self_output_kernel(%arg0: i32, %arg1: memref<16x32xf32, #tpu.memory_space<vmem>>, %arg2: memref<16x32xf32, #tpu.memory_space<vmem>>, %arg3: memref<32x32xf32, #tpu.memory_space<vmem>>, %arg4: memref<1x32xf32, #tpu.memory_space<vmem>>, %arg5: memref<1x32xf32, #tpu.memory_space<vmem>>, %arg6: memref<1x32xf32, #tpu.memory_space<vmem>>, %arg7: memref<16x32xf32, #tpu.memory_space<vmem>>) attributes {dimension_semantics = [#tpu.dimension_semantics<parallel>], iteration_bounds = array<i64: 1>, scalar_prefetch = 0 : i64, scratch_operands = 0 : i64, tpu.core_type = #tpu.core_type<tc>, window_params = [{transform_indices = @transform_0, window_bounds = array<i64: 16, 32>}, {transform_indices = @transform_1, window_bounds = array<i64: 16, 32>}, {pipeline_mode = #tpu.pipeline_mode<synchronous>, transform_indices = @transform_2, window_bounds = array<i64: 32, 32>}, {pipeline_mode = #tpu.pipeline_mode<synchronous>, transform_indices = @transform_3, window_bounds = array<i64: 1, 32>}, {pipeline_mode = #tpu.pipeline_mode<synchronous>, transform_indices = @transform_4, window_bounds = array<i64: 1, 32>}, {pipeline_mode = #tpu.pipeline_mode<synchronous>, transform_indices = @transform_5, window_bounds = array<i64: 1, 32>}, {transform_indices = @transform_6, window_bounds = array<i64: 16, 32>}]} {
    %c0 = arith.constant 0 : index
    %c0_0 = arith.constant 0 : index
    %0 = vector.load %arg1[%c0, %c0_0] : memref<16x32xf32, #tpu.memory_space<vmem>>, vector<16x32xf32>
    %c0_1 = arith.constant 0 : index
    %c0_2 = arith.constant 0 : index
    %1 = vector.load %arg3[%c0_1, %c0_2] : memref<32x32xf32, #tpu.memory_space<vmem>>, vector<32x32xf32>
    %cst = arith.constant dense<0.000000e+00> : vector<16x32xf32>
    %2 = tpu.matmul %0, %1, %cst {dimension_numbers = #tpu.dot_dimension_numbers<[1], [0], [0], [1], [0, 0, 1, 1], [], []>} : vector<16x32xf32>, vector<32x32xf32>, vector<16x32xf32> -> vector<16x32xf32>
    %c0_3 = arith.constant 0 : index
    %c0_4 = arith.constant 0 : index
    %3 = vector.load %arg4[%c0_3, %c0_4] : memref<1x32xf32, #tpu.memory_space<vmem>>, vector<1x32xf32>
    %4 = vector.broadcast %3 : vector<1x32xf32> to vector<16x32xf32>
    %5 = arith.addf %2, %4 : vector<16x32xf32>
    %cst_5 = arith.constant 0.000000e+00 : f32
    %6 = vector.broadcast %cst_5 : f32 to vector<16x32xf32>
    %7 = arith.maximumf %5, %6 : vector<16x32xf32>
    %c0_6 = arith.constant 0 : index
    %c0_7 = arith.constant 0 : index
    %8 = vector.load %arg2[%c0_6, %c0_7] : memref<16x32xf32, #tpu.memory_space<vmem>>, vector<16x32xf32>
    %9 = arith.addf %7, %8 : vector<16x32xf32>
    %cst_8 = arith.constant dense<0.000000e+00> : vector<16xf32>
    %10 = vector.multi_reduction <add>, %9, %cst_8 [1] : vector<16x32xf32> to vector<16xf32>
    %11 = vector.shape_cast %10 : vector<16xf32> to vector<16x1xf32>
    %cst_9 = arith.constant 3.200000e+01 : f32
    %12 = vector.broadcast %cst_9 : f32 to vector<16x1xf32>
    %13 = arith.divf %11, %12 : vector<16x1xf32>
    %14 = vector.broadcast %13 : vector<16x1xf32> to vector<16x32xf32>
    %15 = arith.subf %9, %14 : vector<16x32xf32>
    %16 = arith.mulf %15, %15 : vector<16x32xf32>
    %cst_10 = arith.constant dense<0.000000e+00> : vector<16xf32>
    %17 = vector.multi_reduction <add>, %16, %cst_10 [1] : vector<16x32xf32> to vector<16xf32>
    %18 = vector.shape_cast %17 : vector<16xf32> to vector<16x1xf32>
    %cst_11 = arith.constant 3.200000e+01 : f32
    %19 = vector.broadcast %cst_11 : f32 to vector<16x1xf32>
    %20 = arith.divf %18, %19 : vector<16x1xf32>
    %21 = vector.broadcast %13 : vector<16x1xf32> to vector<16x32xf32>
    %22 = arith.subf %9, %21 : vector<16x32xf32>
    %cst_12 = arith.constant 9.99999974E-6 : f32
    %23 = vector.broadcast %cst_12 : f32 to vector<16x1xf32>
    %24 = arith.addf %20, %23 : vector<16x1xf32>
    %25 = math.rsqrt %24 : vector<16x1xf32>
    %26 = vector.broadcast %25 : vector<16x1xf32> to vector<16x32xf32>
    %27 = arith.mulf %22, %26 : vector<16x32xf32>
    %c0_13 = arith.constant 0 : index
    %c0_14 = arith.constant 0 : index
    %28 = vector.load %arg5[%c0_13, %c0_14] : memref<1x32xf32, #tpu.memory_space<vmem>>, vector<1x32xf32>
    %29 = vector.broadcast %28 : vector<1x32xf32> to vector<16x32xf32>
    %30 = arith.mulf %27, %29 : vector<16x32xf32>
    %c0_15 = arith.constant 0 : index
    %c0_16 = arith.constant 0 : index
    %31 = vector.load %arg6[%c0_15, %c0_16] : memref<1x32xf32, #tpu.memory_space<vmem>>, vector<1x32xf32>
    %32 = vector.broadcast %31 : vector<1x32xf32> to vector<16x32xf32>
    %33 = arith.addf %30, %32 : vector<16x32xf32>
    %c0_17 = arith.constant 0 : index
    %c0_18 = arith.constant 0 : index
    %34 = vector.load %arg7[%c0_17, %c0_18] : memref<16x32xf32, #tpu.memory_space<vmem>>, vector<16x32xf32>
    tpu.vector_store %arg7[%c0_17, %c0_18], %33 {strides = array<i32>} : memref<16x32xf32, #tpu.memory_space<vmem>>, vector<16x32xf32>,
    return
  }
  func.func @transform_0(%arg0: i32) -> (i32, i32) {
    %c0_i32 = arith.constant 0 : i32
    %c0_i32_0 = arith.constant 0 : i32
    return %arg0, %c0_i32 : i32, i32
  }
  func.func @transform_1(%arg0: i32) -> (i32, i32) {
    %c0_i32 = arith.constant 0 : i32
    %c0_i32_0 = arith.constant 0 : i32
    return %arg0, %c0_i32 : i32, i32
  }
  func.func @transform_2(%arg0: i32) -> (i32, i32) {
    %c0_i32 = arith.constant 0 : i32
    %c0_i32_0 = arith.constant 0 : i32
    %c0_i32_1 = arith.constant 0 : i32
    return %c0_i32, %c0_i32_0 : i32, i32
  }
  func.func @transform_3(%arg0: i32) -> (i32, i32) {
    %c0_i32 = arith.constant 0 : i32
    %c0_i32_0 = arith.constant 0 : i32
    %c0_i32_1 = arith.constant 0 : i32
    return %c0_i32, %c0_i32_0 : i32, i32
  }
  func.func @transform_4(%arg0: i32) -> (i32, i32) {
    %c0_i32 = arith.constant 0 : i32
    %c0_i32_0 = arith.constant 0 : i32
    %c0_i32_1 = arith.constant 0 : i32
    return %c0_i32, %c0_i32_0 : i32, i32
  }
  func.func @transform_5(%arg0: i32) -> (i32, i32) {
    %c0_i32 = arith.constant 0 : i32
    %c0_i32_0 = arith.constant 0 : i32
    %c0_i32_1 = arith.constant 0 : i32
    return %c0_i32, %c0_i32_0 : i32, i32
  }
  func.func @transform_6(%arg0: i32) -> (i32, i32) {
    %c0_i32 = arith.constant 0 : i32
    %c0_i32_0 = arith.constant 0 : i32
    return %arg0, %c0_i32 : i32, i32
  }
}

</mosaic_0001>

<bundles_post_ra>
// kernel: tpu_custom_call.1
= control target key start
LH: loop header
LB: loop body
LE: loop exit
PB: predicated region body
PF: predicated region fallthrough
CT: control target
= control target key end

     0   :  { %11 = vsyncpa [#allocation3], 0  ;;  %s638_s0 = inlined_call_operand.hbm [shape: f32[16,32], index: 0, kind: input, shape index: {}]   ;;  %s639_s1 = inlined_call_operand.hbm [shape: f32[16,32], index: 1, kind: input, shape index: {}]   ;;  %s640_s2 = inlined_call_operand.hbm [shape: f32[32,32], index: 2, kind: input, shape index: {}]   ;;  %s641_s3 = inlined_call_operand.hbm [shape: f32[1,32], index: 3, kind: input, shape index: {}]   ;;  %s642_s4 = inlined_call_operand.hbm [shape: f32[1,32], index: 4, kind: input, shape index: {}]   ;;  %s643_s5 = inlined_call_operand.hbm [shape: f32[1,32], index: 5, kind: input, shape index: {}]   ;;  %s644_s6 = inlined_call_operand.hbm [shape: f32[16,32], index: 6, kind: output, shape index: {}]  }
   0x1   :  { %12 = vsyncpa [#allocation6], 0 }
   0x2   :  { %13 = vsyncpa [#allocation9], 0 }
   0x3   :  { %14 = vsyncpa [#allocation12], 0 }
   0x4   :  { %15 = vsyncpa [#allocation4], 0  ;;  %s475_s21 = smov [#allocation5]   ;;  %s476_s23 = smov [#allocation8]  }
   0x5   :  { %s33_s22 = sshll.u32 %s475_s21, 4  ;;  %s58_s24 = sshll.u32 %s476_s23, 4  ;;  %s34_s22 = int_to_ptr.vmem [resolvable:$true] %s33_s22  ;;  %s519_s24 = int_to_ptr.vmem [resolvable:$true] %s58_s24 }
   0x6   :  { %s311_s27 = scalar_lea.hbm %s639_s1, 256 }
   0x7   :  { %p312_p0 = scmp.ne.s32.totalorder %s639_s1, %s311_s27  ;;  %p315_p1 = scmp.lt.u32.totalorder %s311_s27, %s639_s1 }
   0x9   :  { %p317_p2 = pnand %p315_p1, %p312_p0 }
   0xb   :  { %320 = shalt.err (!%p317_p2)
}
   0xc   :  { %s321_s8 = scalar_lea.vmem %s34_s22, 256  ;;  %p326_p4 = scmp.lt.s32.totalorder %s34_s22, %s34_s22 }
   0xd   :  { %p322_p3 = scmp.ne.s32.totalorder %s34_s22, %s321_s8  ;;  %p327_p5 = scmp.lt.s32.totalorder %s321_s8, %s321_s8 }
   0xf   :  { %p328_p6 = por %p327_p5, %p326_p4 }
  0x11   :  { %p329_p7 = pnand %p328_p6, %p322_p3 }
  0x13   :  { %332 = shalt.err (!%p329_p7)
}
  0x14   :  { %s477_s9 = smov 128   ;;  %s478_s10 = smov 8  }
  0x15   :  { %39 = dma.hbm_to_vmem [thread:$0]  %s639_s1, 256, %s34_s22, [#allocation6], %s477_s9, %s477_s9, %s478_s10  }
  0x16   :  { %s333_s15 = scalar_lea.hbm %s641_s3, 16 }
  0x17   :  { %p334_p8 = scmp.ne.s32.totalorder %s641_s3, %s333_s15  ;;  %p337_p9 = scmp.lt.u32.totalorder %s333_s15, %s641_s3 }
  0x19   :  { %p339_p10 = pnand %p337_p9, %p334_p8 }
  0x1b   :  { %342 = shalt.err (!%p339_p10)
}
  0x1c   :  { %s343_s20 = scalar_lea.vmem %s519_s24, 16  ;;  %s347_s1 = scalar_lea.vmem %s519_s24, 32 }
  0x1d   :  { %p344_p11 = scmp.ne.s32.totalorder %s519_s24, %s343_s20  ;;  %p348_p12 = scmp.lt.s32.totalorder %s519_s24, %s519_s24 }
  0x1e   :  { %p349_p13 = scmp.lt.s32.totalorder %s347_s1, %s343_s20 }
  0x20   :  { %p350_p0 = por %p349_p13, %p348_p12 }
  0x22   :  { %p351_p1 = pnand %p350_p0, %p344_p11 }
  0x24   :  { %354 = shalt.err (!%p351_p1)
}
  0x25   :  { %61 = dma.hbm_to_vmem [thread:$0]  %s641_s3, 16, %s519_s24, [#allocation9]  }
  0x26   :  { %s479_s23 = smov [#allocation2]   ;;  %s480_s26 = smov [#allocation7]  }
  0x27   :  { %s21_s25 = sshll.u32 %s479_s23, 4  ;;  %s45_s27 = sshll.u32 %s480_s26, 4  ;;  %s22_s25 = int_to_ptr.vmem [resolvable:$true] %s21_s25  ;;  %s554_s27 = int_to_ptr.vmem [resolvable:$true] %s45_s27 }
  0x28   :  { %s355_s30 = scalar_lea.hbm %s638_s0, 256 }
  0x29   :  { %p356_p2 = scmp.ne.s32.totalorder %s638_s0, %s355_s30  ;;  %p359_p3 = scmp.lt.u32.totalorder %s355_s30, %s638_s0 }
  0x2b   :  { %p361_p4 = pnand %p359_p3, %p356_p2 }
  0x2d   :  { %364 = shalt.err (!%p361_p4)
}
  0x2e   :  { %s365_s3 = scalar_lea.vmem %s22_s25, 256  ;;  %p370_p6 = scmp.lt.s32.totalorder %s22_s25, %s22_s25 }
  0x2f   :  { %p366_p5 = scmp.ne.s32.totalorder %s22_s25, %s365_s3  ;;  %p371_p7 = scmp.lt.s32.totalorder %s365_s3, %s365_s3 }
  0x31   :  { %p372_p8 = por %p371_p7, %p370_p6 }
  0x33   :  { %p373_p9 = pnand %p372_p8, %p366_p5 }
  0x35   :  { %376 = shalt.err (!%p373_p9)
}
  0x36   :  { %27 = dma.hbm_to_vmem [thread:$0]  %s638_s0, 256, %s22_s25, [#allocation3], %s477_s9, %s477_s9, %s478_s10  }
  0x37   :  { %s377_s16 = scalar_lea.hbm %s640_s2, 512 }
  0x38   :  { %p378_p10 = scmp.ne.s32.totalorder %s640_s2, %s377_s16  ;;  %p381_p11 = scmp.lt.u32.totalorder %s377_s16, %s640_s2 }
  0x3a   :  { %p383_p12 = pnand %p381_p11, %p378_p10 }
  0x3c   :  { %386 = shalt.err (!%p383_p12)
}
  0x3d   :  { %s387_s1 = scalar_lea.vmem %s554_s27, 512  ;;  %p392_p0 = scmp.lt.s32.totalorder %s554_s27, %s554_s27 }
  0x3e   :  { %p388_p13 = scmp.ne.s32.totalorder %s554_s27, %s387_s1  ;;  %p393_p1 = scmp.lt.s32.totalorder %s387_s1, %s387_s1 }
  0x40   :  { %p394_p2 = por %p393_p1, %p392_p0 }
  0x42   :  { %p395_p3 = pnand %p394_p2, %p388_p13 }
  0x44   :  { %398 = shalt.err (!%p395_p3)
}
  0x45   :  { %51 = dma.hbm_to_vmem [thread:$0]  %s640_s2, 512, %s554_s27, [#allocation6], %s477_s9, %s477_s9, %s478_s10  }
  0x46   :  { %s481_s22 = smov [#allocation10]   ;;  %s482_s25 = smov [#allocation11]  }
  0x47   :  { %s68_s23 = sshll.u32 %s481_s22, 4  ;;  %s78_s26 = sshll.u32 %s482_s25, 4  ;;  %s69_s23 = int_to_ptr.vmem [resolvable:$true] %s68_s23  ;;  %s79_s26 = int_to_ptr.vmem [resolvable:$true] %s78_s26 }
  0x48   :  { %s399_s30 = scalar_lea.hbm %s642_s4, 16 }
  0x49   :  { %p400_p4 = scmp.ne.s32.totalorder %s642_s4, %s399_s30  ;;  %p403_p5 = scmp.lt.u32.totalorder %s399_s30, %s642_s4 }
  0x4b   :  { %p405_p6 = pnand %p403_p5, %p400_p4 }
  0x4d   :  { %408 = shalt.err (!%p405_p6)
}
  0x4e   :  { %s409_s2 = scalar_lea.vmem %s69_s23, 16  ;;  %s413_s27 = scalar_lea.vmem %s69_s23, 32 }
  0x4f   :  { %p410_p7 = scmp.ne.s32.totalorder %s69_s23, %s409_s2  ;;  %p414_p8 = scmp.lt.s32.totalorder %s69_s23, %s69_s23 }
  0x50   :  { %p415_p9 = scmp.lt.s32.totalorder %s413_s27, %s409_s2 }
  0x52   :  { %p416_p10 = por %p415_p9, %p414_p8 }
  0x54   :  { %p417_p11 = pnand %p416_p10, %p410_p7 }
  0x56   :  { %420 = shalt.err (!%p417_p11)
}
  0x57   :  { %71 = dma.hbm_to_vmem [thread:$0]  %s642_s4, 16, %s69_s23, [#allocation9]  }
  0x58   :  { %s421_s15 = scalar_lea.hbm %s643_s5, 16 }
  0x59   :  { %p422_p12 = scmp.ne.s32.totalorder %s643_s5, %s421_s15  ;;  %p425_p13 = scmp.lt.u32.totalorder %s421_s15, %s643_s5 }
  0x5b   :  { %p427_p0 = pnand %p425_p13, %p422_p12 }
  0x5d   :  { %430 = shalt.err (!%p427_p0)
}
  0x5e   :  { %s431_s20 = scalar_lea.vmem %s79_s26, 16  ;;  %s435_s1 = scalar_lea.vmem %s79_s26, 32 }
  0x5f   :  { %p432_p1 = scmp.ne.s32.totalorder %s79_s26, %s431_s20  ;;  %p436_p2 = scmp.lt.s32.totalorder %s79_s26, %s79_s26 }
  0x60   :  { %p437_p3 = scmp.lt.s32.totalorder %s435_s1, %s431_s20 }
  0x62   :  { %p438_p4 = por %p437_p3, %p436_p2 }
  0x64   :  { %p439_p5 = pnand %p438_p4, %p432_p1 }
  0x66   :  { %442 = shalt.err (!%p439_p5)
}
  0x67   :  { %81 = dma.hbm_to_vmem [thread:$0]  %s643_s5, 16, %s79_s26, [#allocation12]  }
  0x68   :  { %465 = dma.done.wait [#allocation3], 256  }
  0x69   :  { %466 = vsyncadd [#allocation3], 4294967040 }
  0x6a   :  { %467 = dma.done.wait [#allocation6], 768  }
  0x6b   :  { %468 = vsyncadd [#allocation6], 4294966528 }
  0x6c   :  { %469 = dma.done.wait [#allocation9], 32  }
  0x6d   :  { %470 = vsyncadd [#allocation9], 4294967264 }
  0x6e   :  { %471 = dma.done.wait [#allocation12], 16  }
  0x6f   :  { %472 = vsyncadd [#allocation12], 4294967280  ;;  %vm113_vm0 = vcmask 261120   ;;  %v102_v0 = vld [vmem:[#allocation7] sm:$0xff]  ;;  %v103_v1 = vld [vmem:[#allocation7 + $0x8] sm:$0xff]  ;;  %s483_s5 = smov [#allocation13]  }
  0x70   :  { %v104_v2 = vld [vmem:[#allocation7 + $0x10] sm:$0xff]  ;;  %v290_v3 = vpack.c.bf16 %v103_v1, %v102_v0  ;;  %v105_v4 = vld [vmem:[#allocation7 + $0x18] sm:$0xff]  ;;  %v100_v5 = vld [vmem:[#allocation2] sm:$0xff]  ;;  %s253_s21 = sshll.u32 %s483_s5, 4  ;;  %s254_s21 = int_to_ptr.vmem [resolvable:$true] %s253_s21 }
  0x71   :  { %v294_v6 = vpack.c.bf16 %v105_v4, %v104_v2  ;;  %287 = vmatprep.mubr.msk.f32.mxu0 %vm113_vm0, %v100_v5  ;;  %v101_v7 = vld [vmem:[#allocation2 + $0x8] sm:$0xff]  ;;  %v268_v8 = vld [vmem:[#allocation8] ss:$0 sm:$0xff]  ;;  %v197_v13 = vld [vmem:[#allocation5] sm:$0xff]  ;;  %s443_s22 = scalar_lea.vmem %s254_s21, 256  ;;  %p448_p7 = scmp.lt.s32.totalorder %s254_s21, %s254_s21 }
  0x72   :  { %291 = vmatprep.subr.bf16.mxu0 %v290_v3  ;;  %v198_v16 = vld [vmem:[#allocation5 + $0x8] sm:$0xff]  ;;  %v271_v38 = vld [vmem:[#allocation10] ss:$0 sm:$0xff]  ;;  %v272_v40 = vld [vmem:[#allocation11] ss:$0 sm:$0xff]  ;;  %p444_p6 = scmp.ne.s32.totalorder %s254_s21, %s443_s22  ;;  %p449_p8 = scmp.lt.s32.totalorder %s443_s22, %s443_s22 }
  0x73   :  { %293 = vmatpush3.bf16.msra.mxu0 %v290_v3 }
  0x74   :  { %295 = vmatprep.subr.bf16.mxu0 %v294_v6  ;;  %p450_p9 = por %p449_p8, %p448_p7 }
  0x76   :  { %p451_p10 = pnand %p450_p9, %p444_p6 }
  0x77   :  { %297 = vmatpush3.bf16.msra.mxu0 %v294_v6 }
  0x7a   :  { %288 = vmatmul.mubr.msk.f32.vlgmr.msra.gmra.mrb[0].mxu0 %vm113_vm0, %v101_v7 }
 0x14d   :  { %v289_v9 = vpop.f32.mrb[0].mxu0 }
 0x14e   :  { %v192_v10 = vadd.f32 %v289_v9, %v268_v8  ;;  %v186_v11 = vpop.f32.mrb[1].mxu0 }
 0x14f   :  { %v187_v12 = vadd.f32 %v268_v8, %v186_v11 }
 0x150   :  { %v196_v14 = vmax.f32 %v192_v10, 0.0 }
 0x151   :  { %v195_v15 = vmax.f32 %v187_v12, 0.0 }
 0x152   :  { %v200_v19 = vadd.f32 %v198_v16, %v196_v14 }
 0x153   :  { %v199_v17 = vadd.f32 %v197_v13, %v195_v15 }
 0x154   :  { %v204_v20 = vsel %vm113_vm0, %v200_v19, 0.0 }
 0x155   :  { %v201_v18 = vsel %vm113_vm0, %v199_v17, 0.0 }
 0x156   :  { %202 = vadd.xlane.f32.xlu0 %v201_v18 }
 0x15a   :  { %205 = vadd.xlane.f32.xlu0 %v204_v20 }
 0x1e3   :  { %v203_v21 = vpop.xlane.xlu0 %202 }
 0x1e4   :  { %v208_v22 = vmul.f32 0.03125, %v203_v21 }
 0x1e6   :  { %v210_v23 = vsub.f32 %v199_v17, %v208_v22 }
 0x1e7   :  { %v206_v24 = vpop.xlane.xlu0 %205 }
 0x1e8   :  { %v209_v25 = vmul.f32 0.03125, %v206_v24  ;;  %v212_v26 = vmul.f32 %v210_v23, %v210_v23 }
 0x1ea   :  { %v211_v27 = vsub.f32 %v200_v19, %v209_v25  ;;  %v214_v28 = vsel %vm113_vm0, %v212_v26, 0.0 }
 0x1eb   :  { %215 = vadd.xlane.f32.xlu1 %v214_v28 }
 0x1ec   :  { %v213_v29 = vmul.f32 %v211_v27, %v211_v27 }
 0x1ee   :  { %v217_v30 = vsel %vm113_vm0, %v213_v29, 0.0 }
 0x1ef   :  { %218 = vadd.xlane.f32.xlu1 %v217_v30 }
 0x278   :  { %v216_v31 = vpop.xlane.xlu1 %215 }
 0x279   :  { %v220_v32 = vmul.f32 0.03125, %v216_v31 }
 0x27b   :  { %v222_v33 = vadd.f32 1e-05, %v220_v32 }
 0x27c   :  { %v219_v34 = vpop.xlane.xlu1 %218 }
 0x27d   :  { %307 = vrsqrt.f32 %v222_v33  ;;  %v221_v35 = vmul.f32 0.03125, %v219_v34 }
 0x27f   :  { %v223_v36 = vadd.f32 1e-05, %v221_v35 }
 0x281   :  { %309 = vrsqrt.f32 %v223_v36 }
 0x287   :  { %v308_v37 = vpop.eup %307 }
 0x288   :  { %v226_v39 = vmul.f32 %v308_v37, %v210_v23 }
 0x28a   :  { %v235_v41 = vmul.f32 %v271_v38, %v226_v39 }
 0x28b   :  { %v310_v42 = vpop.eup %309 }
 0x28c   :  { %v227_v43 = vmul.f32 %v310_v42, %v211_v27  ;;  %v244_v44 = vadd.f32 %v272_v40, %v235_v41 }
 0x28e   :  { %v236_v45 = vmul.f32 %v271_v38, %v227_v43  ;;  %246 = vst.msk [vmem:[#allocation13] sm:$0xff] %vm113_vm0, %v244_v44 }
 0x290   :  { %v245_v46 = vadd.f32 %v272_v40, %v236_v45 }
 0x292   :  { %247 = vst.msk [vmem:[#allocation13 + $0x8] sm:$0xff] %vm113_vm0, %v245_v46 }
 0x293   :  { %454 = shalt.err (!%p451_p10)
}
 0x294   :  { %s455_s26 = scalar_lea.hbm %s644_s6, 256 }
 0x295   :  { %p456_p11 = scmp.ne.s32.totalorder %s644_s6, %s455_s26  ;;  %p459_p12 = scmp.lt.u32.totalorder %s455_s26, %s644_s6 }
 0x297   :  { %p461_p13 = pnand %p459_p12, %p456_p11 }
 0x299   :  { %464 = shalt.err (!%p461_p13)
}
 0x29a   :  { %259 = dma.vmem_to_hbm [thread:$0]  %s254_s21, 256, %s644_s6, [#allocation4], %s477_s9, %s477_s9, %s478_s10  }
 0x29b   :  { %473 = dma.done.wait [#allocation4], 256  }
 0x29c   :  { %474 = vsyncadd [#allocation4], 4294967040 }
 0x29d   :  { %263 = vsyncpa [#allocation3], 1 }
 0x29e   :  { %264 = vsyncpa [#allocation6], 1 }
 0x29f   :  { %265 = vsyncpa [#allocation9], 1 }
 0x2a0   :  { %266 = vsyncpa [#allocation12], 1 }
 0x2a1   :  { %267 = vsyncpa [#allocation4], 1 }

</bundles_post_ra>
